<compile_context>
chip_gen: v7x
topology: tpu7x:2x2x1
jax: 0.10.0
libtpu: 0.0.40
codegen_flags: <defaults>
</compile_context>

<pallas_src>
import functools

import jax
import jax.numpy as jnp
from jax import lax
from jax.experimental import pallas as pl
from jax.experimental.pallas import tpu as pltpu

EPS = 1e-5
_FOLD_MAX_K = 2048        # fold the seq-index-0 gather into Linear1 up to this K
_TM_TARGET = 512          # row tile: >=256 amortizes per-step overhead; mult of 8
_VMEM_LIMIT = 32 * 1024 * 1024


def _round_up(v, m):
    return (v + m - 1) // m * m


# -----------------------------------------------------------------------------
# Kernels
# -----------------------------------------------------------------------------
def _stats_kernel(x_ref, w1_ref, stats_ref, *, tm, n_total):
    """Pass A: per-channel sum / sum-of-squares of h = x @ w1 over the batch."""
    i = pl.program_id(0)

    @pl.when(i == 0)
    def _():
        stats_ref[...] = jnp.zeros_like(stats_ref)

    h = jnp.dot(x_ref[...].astype(w1_ref.dtype), w1_ref[...],
                preferred_element_type=jnp.float32)            # (TM, C) f32
    if n_total % tm != 0:                                       # mask ragged tail
        row = i * tm + lax.broadcasted_iota(jnp.int32, h.shape, 0)
        h = jnp.where(row < n_total, h, 0.0)

    # Cross-sublane reduces (XLU). Switch to ones(1,TM) @ h on the MXU if these
    # ever saturate the VALU/XLU slots (they do not at C = 128).
    s = jnp.sum(h, axis=0, keepdims=True)                       # (1, C)
    sq = jnp.sum(h * h, axis=0, keepdims=True)                  # (1, C)
    stats_ref[...] += jnp.concatenate([s, sq], axis=0)          # full-tile store


def _apply_kernel(x_ref, w1_ref, w2_ref, pc_ref, stats_ref, o_ref, *, inv_n):
    """Pass B: BN(train) folded into one FMA + ReLU + Linear2 + bias + ReLU."""
    h = jnp.dot(x_ref[...].astype(w1_ref.dtype), w1_ref[...],
                preferred_element_type=jnp.float32)            # (TM, C) f32

    mean = stats_ref[0:1, :] * inv_n                            # (1, C)
    var = jnp.maximum(stats_ref[1:2, :] * inv_n - mean * mean, 0.0)
    gamma, beta, b2 = pc_ref[0:1, :], pc_ref[1:2, :], pc_ref[2:3, :]
    scale = gamma * lax.rsqrt(var + EPS)                        # rsqrt on EUP
    shift = beta - mean * scale
    h = jnp.maximum(h * scale + shift, 0.0)                     # BN + ReLU (FMA)

    out = jnp.dot(h.astype(w2_ref.dtype), w2_ref[...],
                  preferred_element_type=jnp.float32) + b2
    o_ref[...] = jnp.maximum(out, 0.0).astype(o_ref.dtype)


# -----------------------------------------------------------------------------
# One-time parameter preparation (hoisted out of the per-call path)
# -----------------------------------------------------------------------------
def prepare_params(params, *, in_channels, seq, param_dtype=jnp.float32):
    """Pack / pad / cast parameters once; reuse the result across forwards.

    params = (w1, gamma, beta, w2, b2):
        w1: (in_channels, out_channels)   (already (in, out) layout)
        gamma, beta, b2: (out_channels,)
        w2: (out_channels, out_channels)
    """
    w1, gamma, beta, w2, b2 = params
    c_out = w1.shape[1]
    c_pad = _round_up(c_out, 128)
    k_fold = in_channels * seq

    if k_fold <= _FOLD_MAX_K:
        # Zero-expand w1 so that  x.reshape(N, in*seq) @ w1_eff  equals
        # x.reshape(-1, in, seq)[:, :, 0] @ w1 : the seq-index-0 gather becomes
        # part of the MXU contraction and never materializes in HBM.
        w1_eff = jnp.zeros((k_fold, c_pad), param_dtype)
        w1_eff = w1_eff.at[::seq, :c_out].set(w1.astype(param_dtype))
    else:
        w1_eff = jnp.zeros((in_channels, c_pad), param_dtype)
        w1_eff = w1_eff.at[:, :c_out].set(w1.astype(param_dtype))

    w2p = jnp.zeros((c_pad, c_pad), param_dtype)
    w2p = w2p.at[:c_out, :c_out].set(w2.astype(param_dtype))

    pc = jnp.zeros((3, c_pad), jnp.float32)
    pc = pc.at[0, :c_out].set(gamma.reshape(-1).astype(jnp.float32))
    pc = pc.at[1, :c_out].set(beta.reshape(-1).astype(jnp.float32))
    pc = pc.at[2, :c_out].set(b2.reshape(-1).astype(jnp.float32))
    return w1_eff, w2p, pc


# -----------------------------------------------------------------------------
# Forward
# -----------------------------------------------------------------------------
@functools.partial(jax.jit,
                   static_argnames=("in_channels", "out_channels", "out_dtype"))
def embedding_encoder_forward(x, w1_eff, w2p, pc, *, in_channels, out_channels,
                              out_dtype=jnp.float32):
    """EmbeddingEncoder.forward (training-mode BN) using prepared params.

    x: any shape with x.shape[1] == seq and x.size == N * in_channels * seq.
    Returns (N, out_channels) in out_dtype.
    """
    seq = x.shape[1]
    k_fold = in_channels * seq
    n = x.size // k_fold
    c_pad = w2p.shape[0]

    if w1_eff.shape[0] == k_fold:
        # Gather folded into Linear1 (see prepare_params); pure metadata reshape.
        x_eff = x.reshape(n, k_fold)
    else:
        # TODO(synk): fold this pick into the input DMA (squeezed seq-axis
        # BlockSpec) instead of materializing an (N, in_channels) intermediate.
        x_eff = x.reshape(n, in_channels, seq)[:, :, 0]
    k_eff = x_eff.shape[1]

    tm = min(_TM_TARGET, max(8, _round_up(n, 8)))
    nt = pl.cdiv(n, tm)

    xb = jnp.dtype(x_eff.dtype).itemsize
    wb = jnp.dtype(w1_eff.dtype).itemsize
    ob = jnp.dtype(out_dtype).itemsize

    # ---- pass A: batch statistics (resident (2, C) accumulator) --------------
    stats = pl.pallas_call(
        functools.partial(_stats_kernel, tm=tm, n_total=n),
        out_shape=jax.ShapeDtypeStruct((2, c_pad), jnp.float32),
        grid=(nt,),
        in_specs=[
            pl.BlockSpec((tm, k_eff), lambda i: (i, 0)),        # x tile (pipelined)
            pl.BlockSpec((k_eff, c_pad), lambda i: (0, 0)),     # w1 (resident)
        ],
        out_specs=pl.BlockSpec((2, c_pad), lambda i: (0, 0)),   # accumulator
        compiler_params=pltpu.CompilerParams(
            dimension_semantics=("arbitrary",),
            vmem_limit_bytes=_VMEM_LIMIT),
        cost_estimate=pl.CostEstimate(
            flops=int(2 * n * c_pad * k_eff + 4 * n * c_pad),
            transcendentals=0,
            bytes_accessed=int(n * k_eff * xb + k_eff * c_pad * wb
                               + 2 * c_pad * 4),
        ),
    )(x_eff, w1_eff)

    # ---- pass B: BN-FMA + ReLU + Linear2 + ReLU (independent tiles) ----------
    out = pl.pallas_call(
        functools.partial(_apply_kernel, inv_n=1.0 / n),
        out_shape=jax.ShapeDtypeStruct((n, c_pad), out_dtype),
        grid=(nt,),
        in_specs=[
            pl.BlockSpec((tm, k_eff), lambda i: (i, 0)),        # x tile (pipelined)
            pl.BlockSpec((k_eff, c_pad), lambda i: (0, 0)),     # w1 (resident)
            pl.BlockSpec((c_pad, c_pad), lambda i: (0, 0)),     # w2 (resident)
            pl.BlockSpec((3, c_pad), lambda i: (0, 0)),         # gamma/beta/b2
            pl.BlockSpec((2, c_pad), lambda i: (0, 0)),         # batch stats
        ],
        out_specs=pl.BlockSpec((tm, c_pad), lambda i: (i, 0)),
        compiler_params=pltpu.CompilerParams(
            dimension_semantics=("parallel",),                  # 2 TCs on v7x
            vmem_limit_bytes=_VMEM_LIMIT),
        cost_estimate=pl.CostEstimate(
            flops=int(2 * n * c_pad * (k_eff + c_pad) + 8 * n * c_pad),
            transcendentals=int(nt * c_pad),
            bytes_accessed=int(n * k_eff * xb
                               + (k_eff * c_pad + c_pad * c_pad) * wb
                               + 5 * c_pad * 4 + n * c_pad * ob),
        ),
    )(x_eff, w1_eff, w2p, pc, stats)

    if out_channels != c_pad:
        out = out[:, :out_channels]   # no-op when out_channels % 128 == 0
    return out


# -----------------------------------------------------------------------------
# Init / reference / demo
# -----------------------------------------------------------------------------
def init_params(key, in_channels, out_channels, dtype=jnp.float32):
    """Deterministic synthetic parameter init (stands in for init_weights).

    Linear1's bias is intentionally absent: under training-mode BN it has zero
    effect on the forward output (the mean subtraction absorbs it). BatchNorm
    running_mean / running_var buffers are not tracked (forward output only).
    """
    k1, k2 = jax.random.split(key, 2)
    w1 = (jax.random.normal(k1, (in_channels, out_channels), jnp.float32)
          * 0.02).astype(dtype)
    gamma = jnp.ones((out_channels,), jnp.float32)     # BatchNorm1d weight
    beta = jnp.zeros((out_channels,), jnp.float32)     # BatchNorm1d bias
    w2 = (jax.random.normal(k2, (out_channels, out_channels), jnp.float32)
          * 0.02).astype(dtype)
    b2 = jnp.zeros((out_channels,), jnp.float32)
    return (w1, gamma, beta, w2, b2)


def _reference(x, params, in_channels):
    """Pure-JAX reference (two-pass BN stats) for correctness checking."""
    w1, gamma, beta, w2, b2 = params
    seq = x.shape[1]
    x2 = x.reshape(-1, in_channels, seq)[:, :, 0].astype(jnp.float32)
    h = x2 @ w1.astype(jnp.float32)
    mean = h.mean(axis=0, keepdims=True)
    var = ((h - mean) ** 2).mean(axis=0, keepdims=True)
    h = (h - mean) / jnp.sqrt(var + EPS) * gamma[None, :] + beta[None, :]
    h = jnp.maximum(h, 0.0)
    out = jnp.maximum(h @ w2.astype(jnp.float32) + b2[None, :], 0.0)
    return out


if __name__ == "__main__":
    in_channels = 16
    out_channels = 32
    batch = 8
    seq = 8

    key = jax.random.PRNGKey(0)
    kx, kp = jax.random.split(key)
    # Input (batch, seq, in_channels): each per-batch row-major block has
    # seq * in_channels elements, so reshape(-1, in_channels, seq) gives
    # (batch, in_channels, seq) exactly as in the PyTorch forward.
    x = jax.random.normal(kx, (batch, seq, in_channels), jnp.float32)

    params = init_params(kp, in_channels, out_channels, dtype=jnp.float32)
    # One-time packing/padding — hoisted out of the per-call jitted path.
    prepared = prepare_params(params, in_channels=in_channels, seq=seq,
                              param_dtype=jnp.float32)

    out = embedding_encoder_forward(x, *prepared, in_channels=in_channels,
                                    out_channels=out_channels)
    out = jax.block_until_ready(out)
    assert out.shape == (batch, out_channels), out.shape

    ref = _reference(x, params, in_channels)
    err = float(jnp.max(jnp.abs(out - ref)))
    assert jnp.allclose(out, ref, atol=1e-4, rtol=1e-4), err
    print("KERNEL_OK")
</pallas_src>

<mosaic_0001>
module attributes {stable_mosaic.version = 11 : i64} {
  func.func @_apply_kernel(%arg0: i32, %arg1: memref<8x128xf32, #tpu.memory_space<vmem>>, %arg2: memref<128x128xf32, #tpu.memory_space<vmem>>, %arg3: memref<128x128xf32, #tpu.memory_space<vmem>>, %arg4: memref<3x128xf32, #tpu.memory_space<vmem>>, %arg5: memref<2x128xf32, #tpu.memory_space<vmem>>, %arg6: memref<8x128xf32, #tpu.memory_space<vmem>>) attributes {dimension_semantics = [#tpu.dimension_semantics<parallel>], iteration_bounds = array<i64: 1>, scalar_prefetch = 0 : i64, scratch_operands = 0 : i64, tpu.core_type = #tpu.core_type<tc>, window_params = [{transform_indices = @transform_0, window_bounds = array<i64: 8, 128>}, {pipeline_mode = #tpu.pipeline_mode<synchronous>, transform_indices = @transform_1, window_bounds = array<i64: 128, 128>}, {pipeline_mode = #tpu.pipeline_mode<synchronous>, transform_indices = @transform_2, window_bounds = array<i64: 128, 128>}, {pipeline_mode = #tpu.pipeline_mode<synchronous>, transform_indices = @transform_3, window_bounds = array<i64: 3, 128>}, {pipeline_mode = #tpu.pipeline_mode<synchronous>, transform_indices = @transform_4, window_bounds = array<i64: 2, 128>}, {transform_indices = @transform_5, window_bounds = array<i64: 8, 128>}]} {
    %c0 = arith.constant 0 : index
    %c0_0 = arith.constant 0 : index
    %0 = vector.load %arg1[%c0, %c0_0] : memref<8x128xf32, #tpu.memory_space<vmem>>, vector<8x128xf32>
    %c0_1 = arith.constant 0 : index
    %c0_2 = arith.constant 0 : index
    %1 = vector.load %arg2[%c0_1, %c0_2] : memref<128x128xf32, #tpu.memory_space<vmem>>, vector<128x128xf32>
    %cst = arith.constant dense<0.000000e+00> : vector<8x128xf32>
    %2 = tpu.matmul %0, %1, %cst {dimension_numbers = #tpu.dot_dimension_numbers<[1], [0], [0], [1], [0, 0, 1, 1], [], []>} : vector<8x128xf32>, vector<128x128xf32>, vector<8x128xf32> -> vector<8x128xf32>
    %c0_3 = arith.constant 0 : index
    %c0_4 = arith.constant 0 : index
    %3 = vector.load %arg5[%c0_3, %c0_4] : memref<2x128xf32, #tpu.memory_space<vmem>>, vector<1x128xf32>
    %cst_5 = arith.constant 1.250000e-01 : f32
    %4 = vector.broadcast %cst_5 : f32 to vector<1x128xf32>
    %5 = arith.mulf %3, %4 : vector<1x128xf32>
    %c1 = arith.constant 1 : index
    %c0_6 = arith.constant 0 : index
    %6 = vector.load %arg5[%c1, %c0_6] : memref<2x128xf32, #tpu.memory_space<vmem>>, vector<1x128xf32>
    %cst_7 = arith.constant 1.250000e-01 : f32
    %7 = vector.broadcast %cst_7 : f32 to vector<1x128xf32>
    %8 = arith.mulf %6, %7 : vector<1x128xf32>
    %9 = arith.mulf %5, %5 : vector<1x128xf32>
    %10 = arith.subf %8, %9 : vector<1x128xf32>
    %cst_8 = arith.constant 0.000000e+00 : f32
    %11 = vector.broadcast %cst_8 : f32 to vector<1x128xf32>
    %12 = arith.maximumf %10, %11 : vector<1x128xf32>
    %c0_9 = arith.constant 0 : index
    %c0_10 = arith.constant 0 : index
    %13 = vector.load %arg4[%c0_9, %c0_10] : memref<3x128xf32, #tpu.memory_space<vmem>>, vector<1x128xf32>
    %c1_11 = arith.constant 1 : index
    %c0_12 = arith.constant 0 : index
    %14 = vector.load %arg4[%c1_11, %c0_12] : memref<3x128xf32, #tpu.memory_space<vmem>>, vector<1x128xf32>
    %c2 = arith.constant 2 : index
    %c0_13 = arith.constant 0 : index
    %15 = vector.load %arg4[%c2, %c0_13] : memref<3x128xf32, #tpu.memory_space<vmem>>, vector<1x128xf32>
    %cst_14 = arith.constant 9.99999974E-6 : f32
    %16 = vector.broadcast %cst_14 : f32 to vector<1x128xf32>
    %17 = arith.addf %12, %16 : vector<1x128xf32>
    %18 = math.rsqrt %17 : vector<1x128xf32>
    %19 = arith.mulf %13, %18 : vector<1x128xf32>
    %20 = arith.mulf %5, %19 : vector<1x128xf32>
    %21 = arith.subf %14, %20 : vector<1x128xf32>
    %22 = vector.broadcast %19 : vector<1x128xf32> to vector<8x128xf32>
    %23 = arith.mulf %2, %22 : vector<8x128xf32>
    %24 = vector.broadcast %21 : vector<1x128xf32> to vector<8x128xf32>
    %25 = arith.addf %23, %24 : vector<8x128xf32>
    %cst_15 = arith.constant 0.000000e+00 : f32
    %26 = vector.broadcast %cst_15 : f32 to vector<8x128xf32>
    %27 = arith.maximumf %25, %26 : vector<8x128xf32>
    %c0_16 = arith.constant 0 : index
    %c0_17 = arith.constant 0 : index
    %28 = vector.load %arg3[%c0_16, %c0_17] : memref<128x128xf32, #tpu.memory_space<vmem>>, vector<128x128xf32>
    %cst_18 = arith.constant dense<0.000000e+00> : vector<8x128xf32>
    %29 = tpu.matmul %27, %28, %cst_18 {dimension_numbers = #tpu.dot_dimension_numbers<[1], [0], [0], [1], [0, 0, 1, 1], [], []>} : vector<8x128xf32>, vector<128x128xf32>, vector<8x128xf32> -> vector<8x128xf32>
    %30 = vector.broadcast %15 : vector<1x128xf32> to vector<8x128xf32>
    %31 = arith.addf %29, %30 : vector<8x128xf32>
    %cst_19 = arith.constant 0.000000e+00 : f32
    %32 = vector.broadcast %cst_19 : f32 to vector<8x128xf32>
    %33 = arith.maximumf %31, %32 : vector<8x128xf32>
    %c0_20 = arith.constant 0 : index
    %c0_21 = arith.constant 0 : index
    %34 = vector.load %arg6[%c0_20, %c0_21] : memref<8x128xf32, #tpu.memory_space<vmem>>, vector<8x128xf32>
    tpu.vector_store %arg6[%c0_20, %c0_21], %33 {strides = array<i32>} : memref<8x128xf32, #tpu.memory_space<vmem>>, vector<8x128xf32>,
    return
  }
  func.func @transform_0(%arg0: i32) -> (i32, i32) {
    %c0_i32 = arith.constant 0 : i32
    %c0_i32_0 = arith.constant 0 : i32
    return %arg0, %c0_i32 : i32, i32
  }
  func.func @transform_1(%arg0: i32) -> (i32, i32) {
    %c0_i32 = arith.constant 0 : i32
    %c0_i32_0 = arith.constant 0 : i32
    %c0_i32_1 = arith.constant 0 : i32
    return %c0_i32, %c0_i32_0 : i32, i32
  }
  func.func @transform_2(%arg0: i32) -> (i32, i32) {
    %c0_i32 = arith.constant 0 : i32
    %c0_i32_0 = arith.constant 0 : i32
    %c0_i32_1 = arith.constant 0 : i32
    return %c0_i32, %c0_i32_0 : i32, i32
  }
  func.func @transform_3(%arg0: i32) -> (i32, i32) {
    %c0_i32 = arith.constant 0 : i32
    %c0_i32_0 = arith.constant 0 : i32
    %c0_i32_1 = arith.constant 0 : i32
    return %c0_i32, %c0_i32_0 : i32, i32
  }
  func.func @transform_4(%arg0: i32) -> (i32, i32) {
    %c0_i32 = arith.constant 0 : i32
    %c0_i32_0 = arith.constant 0 : i32
    %c0_i32_1 = arith.constant 0 : i32
    return %c0_i32, %c0_i32_0 : i32, i32
  }
  func.func @transform_5(%arg0: i32) -> (i32, i32) {
    %c0_i32 = arith.constant 0 : i32
    %c0_i32_0 = arith.constant 0 : i32
    return %arg0, %c0_i32 : i32, i32
  }
}

module attributes {stable_mosaic.version = 11 : i64} {
  func.func @_stats_kernel(%arg0: i32, %arg1: memref<8x128xf32, #tpu.memory_space<vmem>>, %arg2: memref<128x128xf32, #tpu.memory_space<vmem>>, %arg3: memref<2x128xf32, #tpu.memory_space<vmem>>) attributes {dimension_semantics = [#tpu.dimension_semantics<arbitrary>], iteration_bounds = array<i64: 1>, scalar_prefetch = 0 : i64, scratch_operands = 0 : i64, tpu.core_type = #tpu.core_type<tc>, window_params = [{transform_indices = @transform_0, window_bounds = array<i64: 8, 128>}, {pipeline_mode = #tpu.pipeline_mode<synchronous>, transform_indices = @transform_1, window_bounds = array<i64: 128, 128>}, {pipeline_mode = #tpu.pipeline_mode<synchronous>, transform_indices = @transform_2, window_bounds = array<i64: 2, 128>}]} {
    %c0_i32 = arith.constant 0 : i32
    %0 = arith.cmpi eq, %arg0, %c0_i32 : i32
    %1 = arith.extui %0 : i1 to i32
    %c0_i32_0 = arith.constant 0 : i32
    %2 = arith.cmpi ne, %1, %c0_i32_0 : i32
    scf.if %2 {
      %cst_10 = arith.constant 0.000000e+00 : f32
      %15 = vector.broadcast %cst_10 : f32 to vector<2x128xf32>
      %c0_11 = arith.constant 0 : index
      %c0_12 = arith.constant 0 : index
      %16 = vector.load %arg3[%c0_11, %c0_12] : memref<2x128xf32, #tpu.memory_space<vmem>>, vector<2x128xf32>
      tpu.vector_store %arg3[%c0_11, %c0_12], %15 {strides = array<i32>} : memref<2x128xf32, #tpu.memory_space<vmem>>, vector<2x128xf32>,
    } else {
    }
    %c0 = arith.constant 0 : index
    %c0_1 = arith.constant 0 : index
    %3 = vector.load %arg1[%c0, %c0_1] : memref<8x128xf32, #tpu.memory_space<vmem>>, vector<8x128xf32>
    %c0_2 = arith.constant 0 : index
    %c0_3 = arith.constant 0 : index
    %4 = vector.load %arg2[%c0_2, %c0_3] : memref<128x128xf32, #tpu.memory_space<vmem>>, vector<128x128xf32>
    %cst = arith.constant dense<0.000000e+00> : vector<8x128xf32>
    %5 = tpu.matmul %3, %4, %cst {dimension_numbers = #tpu.dot_dimension_numbers<[1], [0], [0], [1], [0, 0, 1, 1], [], []>} : vector<8x128xf32>, vector<128x128xf32>, vector<8x128xf32> -> vector<8x128xf32>
    %cst_4 = arith.constant dense<0.000000e+00> : vector<128xf32>
    %6 = vector.multi_reduction <add>, %5, %cst_4 [0] : vector<8x128xf32> to vector<128xf32>
    %7 = vector.shape_cast %6 : vector<128xf32> to vector<1x128xf32>
    %8 = arith.mulf %5, %5 : vector<8x128xf32>
    %cst_5 = arith.constant dense<0.000000e+00> : vector<128xf32>
    %9 = vector.multi_reduction <add>, %8, %cst_5 [0] : vector<8x128xf32> to vector<128xf32>
    %10 = vector.shape_cast %9 : vector<128xf32> to vector<1x128xf32>
    %c0_6 = arith.constant 0 : index
    %c0_7 = arith.constant 0 : index
    %11 = vector.load %arg3[%c0_6, %c0_7] : memref<2x128xf32, #tpu.memory_space<vmem>>, vector<2x128xf32>
    %12 = tpu.concatenate %7, %10 in 0 : vector<1x128xf32>, vector<1x128xf32> -> vector<2x128xf32>
    %13 = arith.addf %11, %12 : vector<2x128xf32>
    %c0_8 = arith.constant 0 : index
    %c0_9 = arith.constant 0 : index
    %14 = vector.load %arg3[%c0_8, %c0_9] : memref<2x128xf32, #tpu.memory_space<vmem>>, vector<2x128xf32>
    tpu.vector_store %arg3[%c0_8, %c0_9], %13 {strides = array<i32>} : memref<2x128xf32, #tpu.memory_space<vmem>>, vector<2x128xf32>,
    return
  }
  func.func @transform_0(%arg0: i32) -> (i32, i32) {
    %c0_i32 = arith.constant 0 : i32
    %c0_i32_0 = arith.constant 0 : i32
    return %arg0, %c0_i32 : i32, i32
  }
  func.func @transform_1(%arg0: i32) -> (i32, i32) {
    %c0_i32 = arith.constant 0 : i32
    %c0_i32_0 = arith.constant 0 : i32
    %c0_i32_1 = arith.constant 0 : i32
    return %c0_i32, %c0_i32_0 : i32, i32
  }
  func.func @transform_2(%arg0: i32) -> (i32, i32) {
    %c0_i32 = arith.constant 0 : i32
    %c0_i32_0 = arith.constant 0 : i32
    %c0_i32_1 = arith.constant 0 : i32
    return %c0_i32, %c0_i32_0 : i32, i32
  }
}

</mosaic_0001>

<bundles_post_ra>
// kernel: embedding_encoder_forward.2
= control target key start
LH: loop header
LB: loop body
LE: loop exit
PB: predicated region body
PF: predicated region fallthrough
CT: control target
= control target key end

     0   :  { %7 = vsyncpa [#allocation3], 0  ;;  %s246_s9 = smov [#allocation2]   ;;  %s291_s0 = inlined_call_operand.vmem [shape: f32[8,128], index: 0, kind: input, shape index: {}]   ;;  %s292_s1 = inlined_call_operand.hbm [shape: f32[128,128], index: 1, kind: input, shape index: {}]   ;;  %s293_s2 = inlined_call_operand.vmem [shape: f32[2,128], index: 2, kind: output, shape index: {}]  }
   0x1   :  { %s15_s10 = sshll.u32 %s246_s9, 4  ;;  %s222_s13 = scalar_lea.hbm %s292_s1, 2048  ;;  %s16_s10 = int_to_ptr.vmem [resolvable:$true] %s15_s10 }
   0x2   :  { %p223_p0 = scmp.ne.s32.totalorder %s292_s1, %s222_s13  ;;  %p226_p1 = scmp.lt.u32.totalorder %s222_s13, %s292_s1 }
   0x4   :  { %p228_p2 = pnand %p226_p1, %p223_p0 }
   0x6   :  { %231 = shalt.err (!%p228_p2)
}
   0x7   :  { %s232_s18 = scalar_lea.vmem %s16_s10, 2048  ;;  %p237_p4 = scmp.lt.s32.totalorder %s16_s10, %s16_s10 }
   0x8   :  { %p233_p3 = scmp.ne.s32.totalorder %s16_s10, %s232_s18  ;;  %p238_p5 = scmp.lt.s32.totalorder %s232_s18, %s232_s18 }
   0xa   :  { %p239_p6 = por %p238_p5, %p237_p4 }
   0xc   :  { %p240_p7 = pnand %p239_p6, %p233_p3 }
   0xe   :  { %243 = shalt.err (!%p240_p7)
}
   0xf   :  { %s247_s19 = smov 128   ;;  %s248_s20 = smov 8  }
  0x10   :  { %21 = dma.hbm_to_vmem [thread:$0]  %s292_s1, 2048, %s16_s10, [#allocation3], %s247_s19, %s247_s19, %s248_s20  }
  0x11   :  { %244 = dma.done.wait [#allocation3], 2048  }
  0x12   :  { %245 = vsyncadd [#allocation3], 4294965248  ;;  %v249_v0 = vmov 0.0|0.0   ;;  %v250_v1 = vmov 0.0   ;;  %vm251_vm0 = vmmov 0   ;;  %v31_v2 = vld [vmem:[#allocation2] sm:$0xff] }
  0x13   :  { %192 = vmatprep.subr.bf16.mxu0 %v249_v0  ;;  %29 = vst [vmem:[%s293_s2] sm:$0x3] %v250_v1  ;;  %189 = vmatprep.mubr.msk.f32.mxu0 %vm251_vm0, %v250_v1  ;;  %v32_v3 = vld [vmem:[#allocation2 + $0x8] sm:$0xff]  ;;  %v33_v4 = vld [vmem:[#allocation2 + $0x10] sm:$0xff]  ;;  %v34_v6 = vld [vmem:[#allocation2 + $0x18] sm:$0xff]  ;;  %vm131_vm1 = vcmask 1040384  }
  0x14   :  { %v193_v5 = vpack.c.bf16 %v32_v3, %v31_v2  ;;  %v196_v7 = vpack.c.bf16 %v34_v6, %v33_v4  ;;  %v35_v8 = vld [vmem:[#allocation2 + $0x20] sm:$0xff]  ;;  %v36_v9 = vld [vmem:[#allocation2 + $0x28] sm:$0xff]  ;;  %v37_v11 = vld [vmem:[#allocation2 + $0x30] sm:$0xff] }
  0x15   :  { %v199_v10 = vpack.c.bf16 %v36_v9, %v35_v8  ;;  %v38_v12 = vld [vmem:[#allocation2 + $0x38] sm:$0xff]  ;;  %v39_v14 = vld [vmem:[#allocation2 + $0x40] sm:$0xff]  ;;  %v40_v15 = vld [vmem:[#allocation2 + $0x48] sm:$0xff] }
  0x16   :  { %194 = vmatpush3.bf16.msra.mxu0 %v193_v5  ;;  %v202_v13 = vpack.c.bf16 %v38_v12, %v37_v11  ;;  %v205_v16 = vpack.c.bf16 %v40_v15, %v39_v14  ;;  %v41_v17 = vld [vmem:[#allocation2 + $0x50] sm:$0xff]  ;;  %v42_v18 = vld [vmem:[#allocation2 + $0x58] sm:$0xff]  ;;  %v43_v20 = vld [vmem:[#allocation2 + $0x60] sm:$0xff] }
  0x17   :  { %195 = vmatprep.subr.bf16.mxu0 %v249_v0  ;;  %v208_v19 = vpack.c.bf16 %v42_v18, %v41_v17  ;;  %v44_v21 = vld [vmem:[#allocation2 + $0x68] sm:$0xff]  ;;  %v45_v23 = vld [vmem:[#allocation2 + $0x70] sm:$0xff]  ;;  %v46_v24 = vld [vmem:[#allocation2 + $0x78] sm:$0xff] }
  0x18   :  { %v211_v22 = vpack.c.bf16 %v44_v21, %v43_v20  ;;  %v214_v25 = vpack.c.bf16 %v46_v24, %v45_v23  ;;  %v30_v26 = vld [vmem:[%s291_s0] sm:$0xff] }
  0x1a   :  { %197 = vmatpush3.bf16.msra.mxu0 %v196_v7  ;;  %v130_v42 = vld [vmem:[%s293_s2] sm:$0x3] }
  0x1b   :  { %198 = vmatprep.subr.bf16.mxu0 %v249_v0 }
  0x1e   :  { %200 = vmatpush3.bf16.msra.mxu0 %v199_v10 }
  0x1f   :  { %201 = vmatprep.subr.bf16.mxu0 %v249_v0 }
  0x22   :  { %203 = vmatpush3.bf16.msra.mxu0 %v202_v13 }
  0x23   :  { %204 = vmatprep.subr.bf16.mxu0 %v249_v0 }
  0x26   :  { %206 = vmatpush3.bf16.msra.mxu0 %v205_v16 }
  0x27   :  { %207 = vmatprep.subr.bf16.mxu0 %v249_v0 }
  0x2a   :  { %209 = vmatpush3.bf16.msra.mxu0 %v208_v19 }
  0x2b   :  { %210 = vmatprep.subr.bf16.mxu0 %v249_v0 }
  0x2e   :  { %212 = vmatpush3.bf16.msra.mxu0 %v211_v22 }
  0x2f   :  { %213 = vmatprep.subr.bf16.mxu0 %v249_v0 }
  0x32   :  { %215 = vmatpush3.bf16.msra.mxu0 %v214_v25 }
  0x35   :  { %190 = vmatmul.mubr.f32.vlgmr.msra.gmra.mrb[0].mxu0 %v30_v26 }
 0x108   :  { %v113_v27 = vpop.f32.mrb[0].mxu0 }
 0x109   :  { %v117_v28 = vrot.slane %v113_v27, 4  ;;  %v123_v29 = vmul.f32 %v113_v27, %v113_v27  ;;  %v191_v30 = vpop.f32.mrb[1].mxu0 }
 0x10b   :  { %v118_v31 = vadd.f32 %v117_v28, %v113_v27  ;;  %v124_v32 = vrot.slane %v123_v29, 4 }
 0x10d   :  { %v119_v33 = vrot.slane %v118_v31, 2  ;;  %v125_v34 = vadd.f32 %v124_v32, %v123_v29 }
 0x10f   :  { %v120_v35 = vadd.f32 %v119_v33, %v118_v31  ;;  %v126_v36 = vrot.slane %v125_v34, 2 }
 0x111   :  { %v121_v37 = vrot.slane %v120_v35, 1  ;;  %v127_v38 = vadd.f32 %v126_v36, %v125_v34 }
 0x113   :  { %v128_v39 = vrot.slane %v127_v38, 1  ;;  %v122_v40 = vadd.f32 %v121_v37, %v120_v35 }
 0x115   :  { %v129_v41 = vadd.f32 %v128_v39, %v127_v38 }
 0x117   :  { %v132_v43 = vsel %vm131_vm1, %v122_v40, %v129_v41 }
 0x118   :  { %v133_v44 = vadd.f32 %v132_v43, %v130_v42 }
 0x11a   :  { %134 = vst [vmem:[%s293_s2] sm:$0x3] %v133_v44 }
 0x11b   :  { %139 = vsyncpa [#allocation3], 1 }

// kernel: embedding_encoder_forward.3
= control target key start
LH: loop header
LB: loop body
LE: loop exit
PB: predicated region body
PF: predicated region fallthrough
CT: control target
= control target key end

     0   :  { %10 = vsyncpa [#allocation3], 0  ;;  %s608_s0 = inlined_call_operand.vmem [shape: f32[8,128], index: 0, kind: input, shape index: {}]   ;;  %s609_s1 = inlined_call_operand.vmem [shape: f32[128,128], index: 1, kind: input, shape index: {}]   ;;  %s610_s2 = inlined_call_operand.hbm [shape: f32[128,128], index: 2, kind: input, shape index: {}]   ;;  %s611_s3 = inlined_call_operand.vmem [shape: f32[3,128], index: 3, kind: input, shape index: {}]   ;;  %s612_s4 = inlined_call_operand.vmem [shape: f32[2,128], index: 4, kind: input, shape index: {}]   ;;  %s613_s5 = inlined_call_operand.hbm [shape: f32[8,128], index: 5, kind: output, shape index: {}]  }
   0x1   :  { %11 = vsyncpa [#allocation4], 0  ;;  %s465_s18 = smov [#allocation2]   ;;  %s417_s22 = scalar_lea.hbm %s610_s2, 2048 }
   0x2   :  { %s21_s19 = sshll.u32 %s465_s18, 4  ;;  %p418_p0 = scmp.ne.s32.totalorder %s610_s2, %s417_s22  ;;  %s22_s19 = int_to_ptr.vmem [resolvable:$true] %s21_s19 }
   0x3   :  { %p421_p1 = scmp.lt.u32.totalorder %s417_s22, %s610_s2 }
   0x5   :  { %p423_p2 = pnand %p421_p1, %p418_p0 }
   0x7   :  { %426 = shalt.err (!%p423_p2)
}
   0x8   :  { %s427_s27 = scalar_lea.vmem %s22_s19, 2048  ;;  %p432_p4 = scmp.lt.s32.totalorder %s22_s19, %s22_s19 }
   0x9   :  { %p428_p3 = scmp.ne.s32.totalorder %s22_s19, %s427_s27  ;;  %p433_p5 = scmp.lt.s32.totalorder %s427_s27, %s427_s27 }
   0xb   :  { %p434_p6 = por %p433_p5, %p432_p4 }
   0xd   :  { %p435_p7 = pnand %p434_p6, %p428_p3 }
   0xf   :  { %438 = shalt.err (!%p435_p7)
}
  0x10   :  { %s466_s28 = smov 128   ;;  %s467_s29 = smov 8  }
  0x11   :  { %27 = dma.hbm_to_vmem [thread:$0]  %s610_s2, 2048, %s22_s19, [#allocation3], %s466_s28, %s466_s28, %s467_s29  }
  0x12   :  { %461 = dma.done.wait [#allocation3], 2048  }
  0x13   :  { %462 = vsyncadd [#allocation3], 4294965248  ;;  %v468_v0 = vmov 0.0|0.0   ;;  %vm469_vm0 = vmmov 0   ;;  %v470_v1 = vmov 0.0   ;;  %v36_v2 = vld [vmem:[%s609_s1] sm:$0xff]  ;;  %v137_v61 = vlaneseq }
  0x14   :  { %360 = vmatprep.subr.bf16.mxu0 %v468_v0  ;;  %322 = vmatprep.mubr.msk.f32.mxu0 %vm469_vm0, %v470_v1  ;;  %v37_v3 = vld [vmem:[%s609_s1 + $0x8] sm:$0xff]  ;;  %v38_v4 = vld [vmem:[%s609_s1 + $0x10] sm:$0xff]  ;;  %v39_v6 = vld [vmem:[%s609_s1 + $0x18] sm:$0xff]  ;;  %s471_s21 = smov [#allocation5]  }
  0x15   :  { %384 = vmatprep.subr.bf16.mxu1 %v468_v0  ;;  %357 = vmatprep.mubr.msk.f32.mxu1 %vm469_vm0, %v470_v1  ;;  %v361_v5 = vpack.c.bf16 %v37_v3, %v36_v2  ;;  %v364_v7 = vpack.c.bf16 %v39_v6, %v38_v4  ;;  %v40_v8 = vld [vmem:[%s609_s1 + $0x20] sm:$0xff]  ;;  %v41_v9 = vld [vmem:[%s609_s1 + $0x28] sm:$0xff]  ;;  %v150_v12 = vld [vmem:[#allocation2 + $0x10] sm:$0xff]  ;;  %v138_v63 = vshrl.u32 %v137_v61, 7  ;;  %s246_s22 = sshll.u32 %s471_s21, 4  ;;  %s247_s22 = int_to_ptr.vmem [resolvable:$true] %s246_s22 }
  0x16   :  { %v148_v10 = vld [vmem:[#allocation2] sm:$0xff]  ;;  %v149_v11 = vld [vmem:[#allocation2 + $0x8] sm:$0xff]  ;;  %v151_v13 = vld [vmem:[#allocation2 + $0x18] sm:$0xff]  ;;  %v367_v14 = vpack.c.bf16 %v41_v9, %v40_v8  ;;  %s439_s23 = scalar_lea.vmem %s247_s22, 128  ;;  %p444_p9 = scmp.lt.s32.totalorder %s247_s22, %s247_s22 }
  0x17   :  { %362 = vmatpush3.bf16.msra.mxu0 %v361_v5  ;;  %v385_v15 = vpack.c.bf16 %v149_v11, %v148_v10  ;;  %v42_v16 = vld [vmem:[%s609_s1 + $0x30] sm:$0xff]  ;;  %v43_v17 = vld [vmem:[%s609_s1 + $0x38] sm:$0xff]  ;;  %v388_v18 = vpack.c.bf16 %v151_v13, %v150_v12  ;;  %v152_v19 = vld [vmem:[#allocation2 + $0x20] sm:$0xff]  ;;  %v139_v2 = vsub.s32 0, %v138_v63  ;;  %p440_p8 = scmp.ne.s32.totalorder %s247_s22, %s439_s23  ;;  %p445_p10 = scmp.lt.s32.totalorder %s439_s23, %s439_s23 }
  0x18   :  { %363 = vmatprep.subr.bf16.mxu0 %v468_v0  ;;  %v153_v20 = vld [vmem:[#allocation2 + $0x28] sm:$0xff]  ;;  %v370_v21 = vpack.c.bf16 %v43_v17, %v42_v16  ;;  %v44_v22 = vld [vmem:[%s609_s1 + $0x40] sm:$0xff]  ;;  %v154_v25 = vld [vmem:[#allocation2 + $0x30] sm:$0xff] }
  0x19   :  { %386 = vmatpush3.bf16.msra.mxu1 %v385_v15  ;;  %v45_v23 = vld [vmem:[%s609_s1 + $0x48] sm:$0xff]  ;;  %v391_v24 = vpack.c.bf16 %v153_v20, %v152_v19  ;;  %v155_v26 = vld [vmem:[#allocation2 + $0x38] sm:$0xff]  ;;  %v46_v28 = vld [vmem:[%s609_s1 + $0x50] sm:$0xff]  ;;  %p446_p11 = por %p445_p10, %p444_p9 }
  0x1a   :  { %387 = vmatprep.subr.bf16.mxu1 %v468_v0  ;;  %v373_v27 = vpack.c.bf16 %v45_v23, %v44_v22  ;;  %v47_v29 = vld [vmem:[%s609_s1 + $0x58] sm:$0xff]  ;;  %v394_v30 = vpack.c.bf16 %v155_v26, %v154_v25  ;;  %v156_v31 = vld [vmem:[#allocation2 + $0x40] sm:$0xff]  ;;  %v157_v32 = vld [vmem:[#allocation2 + $0x48] sm:$0xff] }
  0x1b   :  { %365 = vmatpush3.bf16.msra.mxu0 %v364_v7  ;;  %v376_v33 = vpack.c.bf16 %v47_v29, %v46_v28  ;;  %v48_v34 = vld [vmem:[%s609_s1 + $0x60] sm:$0xff]  ;;  %v49_v35 = vld [vmem:[%s609_s1 + $0x68] sm:$0xff]  ;;  %v397_v36 = vpack.c.bf16 %v157_v32, %v156_v31  ;;  %v158_v37 = vld [vmem:[#allocation2 + $0x50] sm:$0xff]  ;;  %p447_p12 = pnand %p446_p11, %p440_p8 }
  0x1c   :  { %366 = vmatprep.subr.bf16.mxu0 %v468_v0  ;;  %v159_v38 = vld [vmem:[#allocation2 + $0x58] sm:$0xff]  ;;  %v379_v39 = vpack.c.bf16 %v49_v35, %v48_v34  ;;  %v50_v40 = vld [vmem:[%s609_s1 + $0x70] sm:$0xff]  ;;  %v35_v44 = vld [vmem:[%s608_s0] sm:$0xff] }
  0x1d   :  { %389 = vmatpush3.bf16.msra.mxu1 %v388_v18  ;;  %v51_v41 = vld [vmem:[%s609_s1 + $0x78] sm:$0xff]  ;;  %v400_v42 = vpack.c.bf16 %v159_v38, %v158_v37  ;;  %v160_v45 = vld [vmem:[#allocation2 + $0x60] sm:$0xff]  ;;  %v161_v46 = vld [vmem:[#allocation2 + $0x68] sm:$0xff] }
  0x1e   :  { %390 = vmatprep.subr.bf16.mxu1 %v468_v0  ;;  %v382_v43 = vpack.c.bf16 %v51_v41, %v50_v40  ;;  %v403_v47 = vpack.c.bf16 %v161_v46, %v160_v45  ;;  %v162_v48 = vld [vmem:[#allocation2 + $0x70] sm:$0xff]  ;;  %v163_v49 = vld [vmem:[#allocation2 + $0x78] sm:$0xff]  ;;  %v122_v51 = vld [vmem:[%s612_s4] sm:$0x1] }
  0x1f   :  { %368 = vmatpush3.bf16.msra.mxu0 %v367_v14  ;;  %v406_v50 = vpack.c.bf16 %v163_v49, %v162_v48  ;;  %v123_v52 = vmul.f32 0.125, %v122_v51  ;;  %v124_v53 = vld [vmem:[%s612_s4 + $0x1] sm:$0x1]  ;;  %v129_v60 = vld [vmem:[%s611_s3] sm:$0x1] }
  0x20   :  { %369 = vmatprep.subr.bf16.mxu0 %v468_v0  ;;  %v125_v54 = vmul.f32 0.125, %v124_v53  ;;  %v130_v1 = vld [vmem:[%s611_s3 + $0x1] sm:$0x1]  ;;  %v255_v11 = vld [vmem:[%s611_s3 + $0x2] ss:$0 sm:$0xff] }
  0x21   :  { %392 = vmatpush3.bf16.msra.mxu1 %v391_v24  ;;  %v126_v55 = vmul.f32 %v123_v52, %v123_v52 }
  0x22   :  { %393 = vmatprep.subr.bf16.mxu1 %v468_v0 }
  0x23   :  { %371 = vmatpush3.bf16.msra.mxu0 %v370_v21  ;;  %v127_v56 = vsub.f32 %v125_v54, %v126_v55 }
  0x24   :  { %372 = vmatprep.subr.bf16.mxu0 %v468_v0 }
  0x25   :  { %395 = vmatpush3.bf16.msra.mxu1 %v394_v30  ;;  %v128_v57 = vmax.f32 %v127_v56, 0.0 }
  0x26   :  { %396 = vmatprep.subr.bf16.mxu1 %v468_v0 }
  0x27   :  { %374 = vmatpush3.bf16.msra.mxu0 %v373_v27  ;;  %v132_v58 = vadd.f32 1e-05, %v128_v57 }
  0x28   :  { %375 = vmatprep.subr.bf16.mxu0 %v468_v0 }
  0x29   :  { %398 = vmatpush3.bf16.msra.mxu1 %v397_v36  ;;  %415 = vrsqrt.f32 %v132_v58 }
  0x2a   :  { %399 = vmatprep.subr.bf16.mxu1 %v468_v0 }
  0x2b   :  { %377 = vmatpush3.bf16.msra.mxu0 %v376_v33 }
  0x2c   :  { %378 = vmatprep.subr.bf16.mxu0 %v468_v0 }
  0x2d   :  { %401 = vmatpush3.bf16.msra.mxu1 %v400_v42 }
  0x2e   :  { %402 = vmatprep.subr.bf16.mxu1 %v468_v0 }
  0x2f   :  { %380 = vmatpush3.bf16.msra.mxu0 %v379_v39 }
  0x30   :  { %381 = vmatprep.subr.bf16.mxu0 %v468_v0 }
  0x31   :  { %404 = vmatpush3.bf16.msra.mxu1 %v403_v47 }
  0x32   :  { %405 = vmatprep.subr.bf16.mxu1 %v468_v0 }
  0x33   :  { %383 = vmatpush3.bf16.msra.mxu0 %v382_v43  ;;  %v416_v59 = vpop.eup %415 }
  0x34   :  { %v134_v62 = vmul.f32 %v416_v59, %v129_v60 }
  0x35   :  { %407 = vmatpush3.bf16.msra.mxu1 %v406_v50 }
  0x36   :  { %323 = vmatmul.mubr.f32.vlgmr.msra.gmra.mrb[0].mxu0 %v35_v44  ;;  %v135_v0 = vmul.f32 %v134_v62, %v123_v52  ;;  %v140_v4 = vrot.slane %v134_v62, %v139_v2 }
  0x38   :  { %v136_v3 = vsub.f32 %v130_v1, %v135_v0 }
  0x3a   :  { %v145_v5 = vrot.slane %v136_v3, %v139_v2 }
 0x109   :  { %v118_v6 = vpop.f32.mrb[0].mxu0 }
 0x10a   :  { %v141_v7 = vmul.f32 %v140_v4, %v118_v6  ;;  %v324_v8 = vpop.f32.mrb[1].mxu0 }
 0x10c   :  { %v146_v9 = vadd.f32 %v145_v5, %v141_v7 }
 0x10e   :  { %v147_v10 = vmax.f32 %v146_v9, 0.0 }
 0x110   :  { %358 = vmatmul.mubr.f32.vlgmr.msra.gmra.mrb[0].mxu1 %v147_v10 }
 0x1e3   :  { %v234_v12 = vpop.f32.mrb[0].mxu1 }
 0x1e4   :  { %v235_v13 = vadd.f32 %v255_v11, %v234_v12  ;;  %v359_v14 = vpop.f32.mrb[1].mxu1 }
 0x1e6   :  { %v238_v15 = vmax.f32 %v235_v13, 0.0 }
 0x1e8   :  { %239 = vst [vmem:[#allocation5] sm:$0xff] %v238_v15 }
 0x1e9   :  { %450 = shalt.err (!%p447_p12)
}
 0x1ea   :  { %s451_s26 = scalar_lea.hbm %s613_s5, 128 }
 0x1eb   :  { %p452_p13 = scmp.ne.s32.totalorder %s613_s5, %s451_s26  ;;  %p455_p0 = scmp.lt.u32.totalorder %s451_s26, %s613_s5 }
 0x1ed   :  { %p457_p1 = pnand %p455_p0, %p452_p13 }
 0x1ef   :  { %460 = shalt.err (!%p457_p1)
}
 0x1f0   :  { %249 = dma.vmem_to_hbm [thread:$0]  %s247_s22, 128, %s613_s5, [#allocation4]  }
 0x1f1   :  { %463 = dma.done.wait [#allocation4], 128  }
 0x1f2   :  { %464 = vsyncadd [#allocation4], 4294967168 }
 0x1f3   :  { %253 = vsyncpa [#allocation3], 1 }
 0x1f4   :  { %254 = vsyncpa [#allocation4], 1 }

</bundles_post_ra>
